<compile_context>
chip_gen: v5e
topology: v5e:2x2
jax: 0.10.0
libtpu: 0.0.40
codegen_flags: <defaults>
</compile_context>

<pallas_src>
import jax
import jax.numpy as jnp
from jax.experimental import pallas as pl
from jax.experimental.pallas import tpu as pltpu


def _round_up(x, m):
    return ((x + m - 1) // m) * m


def _cdiv(a, b):
    return (a + b - 1) // b


def _pick_batch_tile(B, cap=512):
    """Rows per grid step: multiple of 8, <= cap, split >=2 ways when B >= 16
    so both v7x TensorCores get work on the 'parallel' axis."""
    bp8 = _round_up(B, 8)
    tb = min(cap, bp8)
    if tb == bp8 and bp8 >= 16:
        tb = _round_up(_cdiv(bp8, 2), 8)
    return tb


# ----------------------------------------------------------------------------
# Parameter prep (hoisted out of the per-step call path).
# ----------------------------------------------------------------------------
def prepare_rnn_cell_params(wx_w, wx_b, wy_w, wy_b, compute_dtype=jnp.bfloat16):
    """wx_w: [H, n_inp], wx_b: [H], wy_w: [H, H], wy_b: [H] (PyTorch layouts).

    Returns dict with:
      wxT: [n_inp, H] in compute_dtype
      wyT: [H, H]     in compute_dtype
      b  : [1, H]     f32, pre-summed (wx_b + wy_b)
    """
    H, n_inp = wx_w.shape
    assert wy_w.shape == (H, H) and wx_b.shape == (H,) and wy_b.shape == (H,)
    wxT = jnp.asarray(wx_w).T.astype(compute_dtype)
    wyT = jnp.asarray(wy_w).T.astype(compute_dtype)
    b = (jnp.asarray(wx_b) + jnp.asarray(wy_b)).reshape(1, H).astype(jnp.float32)
    return dict(wxT=wxT, wyT=wyT, b=b, n_inp=n_inp, H=H)


# ----------------------------------------------------------------------------
# Single recurrent step (matches the module's forward exactly).
# ----------------------------------------------------------------------------
def _rnn_cell_kernel(x_ref, h_ref, wx_ref, wy_ref, b_ref, o_ref):
    # Two MXU pushes into one f32 accumulator (no host-side [x|hy] concat/pad).
    acc = jnp.dot(x_ref[...].astype(wx_ref.dtype), wx_ref[...],
                  preferred_element_type=jnp.float32)
    acc += jnp.dot(h_ref[...].astype(wy_ref.dtype), wy_ref[...],
                   preferred_element_type=jnp.float32)
    # act='tanh'; bias add + tanh in f32 (v5e lacks bf16 VPU/EUP), store in
    # the caller's dtype directly — no post-kernel slice/cast pass.
    o_ref[...] = jnp.tanh(acc + b_ref[...]).astype(o_ref.dtype)


def rnn_cell_forward(x, hy, params):
    """hy_new = tanh(x @ WxT + hy @ WyT + b) — one pallas_call, no wrapper passes."""
    wxT, wyT, b = params["wxT"], params["wyT"], params["b"]
    n_inp, H = params["n_inp"], params["H"]
    B = x.shape[0]
    assert x.shape == (B, n_inp) and hy.shape == (B, H)

    tb = _pick_batch_tile(B)
    grid = (_cdiv(B, tb),)

    w_item = jnp.dtype(wxT.dtype).itemsize
    x_item = jnp.dtype(x.dtype).itemsize
    h_item = jnp.dtype(hy.dtype).itemsize
    blk = (2 * tb * n_inp * x_item + 2 * tb * H * h_item        # streamed (2-buffered)
           + n_inp * H * w_item + H * H * w_item + H * 4        # resident weights + bias
           + 2 * tb * H * x_item)                               # output (2-buffered)
    vmem_limit = int(min(max(2 * blk + (4 << 20), 16 << 20), 48 << 20))

    return pl.pallas_call(
        _rnn_cell_kernel,
        out_shape=jax.ShapeDtypeStruct((B, H), x.dtype),
        grid=grid,
        in_specs=[
            pl.BlockSpec((tb, n_inp), lambda i: (i, 0)),   # x tile streamed
            pl.BlockSpec((tb, H), lambda i: (i, 0)),       # hy tile streamed
            pl.BlockSpec((n_inp, H), lambda i: (0, 0)),    # WxT resident in VMEM
            pl.BlockSpec((H, H), lambda i: (0, 0)),        # WyT resident in VMEM
            pl.BlockSpec((1, H), lambda i: (0, 0)),        # fused bias resident
        ],
        out_specs=pl.BlockSpec((tb, H), lambda i: (i, 0)),
        compiler_params=pltpu.CompilerParams(
            dimension_semantics=("parallel",),
            vmem_limit_bytes=vmem_limit,
        ),
    )(x, hy, wxT, wyT, b)


# ----------------------------------------------------------------------------
# Fused recurrent loop: whole sequence in ONE pallas_call, h resident in VMEM.
# ----------------------------------------------------------------------------
def _rnn_seq_kernel(x_ref, h0_ref, wx_ref, wy_ref, b_ref, o_ref, h_scr):
    t = pl.program_id(1)

    @pl.when(t == 0)
    def _():
        h_scr[...] = h0_ref[...].astype(jnp.float32)

    acc = jnp.dot(x_ref[...].astype(wx_ref.dtype), wx_ref[...],
                  preferred_element_type=jnp.float32)
    acc += jnp.dot(h_scr[...].astype(wy_ref.dtype), wy_ref[...],
                   preferred_element_type=jnp.float32)
    h_scr[...] = jnp.tanh(acc + b_ref[...])

    @pl.when(t == pl.num_programs(1) - 1)
    def _():
        o_ref[...] = h_scr[...].astype(o_ref.dtype)


def rnn_sequence_forward(xs, h0, params):
    """Apply the RNN cell over xs: [T, B, n_inp]; returns final hidden [B, H].

    grid = (batch_tiles 'parallel', T 'arbitrary'); h lives in a persistent
    f32 VMEM scratch; weights/bias stay resident; only the final h is written
    to HBM (one store per batch tile)."""
    wxT, wyT, b = params["wxT"], params["wyT"], params["b"]
    n_inp, H = params["n_inp"], params["H"]
    T, B = xs.shape[0], xs.shape[1]
    assert xs.shape == (T, B, n_inp) and h0.shape == (B, H)

    tb = _pick_batch_tile(B)
    grid = (_cdiv(B, tb), T)

    w_item = jnp.dtype(wxT.dtype).itemsize
    x_item = jnp.dtype(xs.dtype).itemsize
    h_item = jnp.dtype(h0.dtype).itemsize
    blk = (2 * tb * n_inp * x_item + 2 * tb * H * h_item
           + n_inp * H * w_item + H * H * w_item + H * 4
           + 2 * tb * H * h_item + tb * H * 4)                  # out + h scratch
    vmem_limit = int(min(max(2 * blk + (4 << 20), 16 << 20), 48 << 20))

    return pl.pallas_call(
        _rnn_seq_kernel,
        out_shape=jax.ShapeDtypeStruct((B, H), h0.dtype),
        grid=grid,
        in_specs=[
            pl.BlockSpec((None, tb, n_inp), lambda bi, t: (t, bi, 0)),  # x_t streamed
            pl.BlockSpec((tb, H), lambda bi, t: (bi, 0)),               # h0 per batch tile
            pl.BlockSpec((n_inp, H), lambda bi, t: (0, 0)),             # WxT resident
            pl.BlockSpec((H, H), lambda bi, t: (0, 0)),                 # WyT resident
            pl.BlockSpec((1, H), lambda bi, t: (0, 0)),                 # bias resident
        ],
        out_specs=pl.BlockSpec((tb, H), lambda bi, t: (bi, 0)),         # final h only
        scratch_shapes=[pltpu.VMEM((tb, H), jnp.float32)],
        compiler_params=pltpu.CompilerParams(
            dimension_semantics=("parallel", "arbitrary"),
            vmem_limit_bytes=vmem_limit,
        ),
    )(xs, h0, wxT, wyT, b)


# ----------------------------------------------------------------------------
# Pure-JAX reference matching torch Linear + tanh semantics.
# ----------------------------------------------------------------------------
def rnn_cell_reference(x, hy, wx_w, wx_b, wy_w, wy_b):
    return jnp.tanh(x @ wx_w.T + wx_b + hy @ wy_w.T + wy_b)


if __name__ == "__main__":
    # Shapes consistent with the module: n_inp=32, n_hid=32, n_ch=1, batch=8, T=6.
    B, n_inp, n_hid, n_ch, T = 8, 32, 32, 1, 6
    H = n_hid * n_ch

    key = jax.random.PRNGKey(0)
    k_x, k_h, k_ww, k_wb, k_yw, k_yb, k_seq = jax.random.split(key, 7)

    x = jax.random.normal(k_x, (B, n_inp), dtype=jnp.float32)
    hy = jax.random.normal(k_h, (B, H), dtype=jnp.float32)
    xs = jax.random.normal(k_seq, (T, B, n_inp), dtype=jnp.float32)

    bound = 1.0 / jnp.sqrt(jnp.float32(n_inp))
    wx_w = jax.random.uniform(k_ww, (H, n_inp), jnp.float32, -bound, bound)
    wx_b = jax.random.uniform(k_wb, (H,), jnp.float32, -bound, bound)

    # Case 1: module default init='eye' (Wy = I, by = 0).
    wy_w_eye = jnp.eye(H, dtype=jnp.float32)
    wy_b_eye = jnp.zeros((H,), dtype=jnp.float32)
    # Case 2: random Wy/by (exercises the hy @ WyT path for real).
    bound_h = 1.0 / jnp.sqrt(jnp.float32(H))
    wy_w_rnd = jax.random.uniform(k_yw, (H, H), jnp.float32, -bound_h, bound_h)
    wy_b_rnd = jax.random.uniform(k_yb, (H,), jnp.float32, -bound_h, bound_h)

    for wy_w, wy_b in ((wy_w_eye, wy_b_eye), (wy_w_rnd, wy_b_rnd)):
        ref = rnn_cell_reference(x, hy, wx_w, wx_b, wy_w, wy_b)

        # f32 weights: tight structural check (single step).
        p32 = prepare_rnn_cell_params(wx_w, wx_b, wy_w, wy_b,
                                      compute_dtype=jnp.float32)
        out = jax.block_until_ready(rnn_cell_forward(x, hy, p32))
        assert out.shape == (B, H) and out.dtype == x.dtype
        assert jnp.allclose(out, ref, atol=1e-5, rtol=1e-5)

        # bf16 weights (default): MXU-native path, loosened tolerance.
        pbf = prepare_rnn_cell_params(wx_w, wx_b, wy_w, wy_b)
        out_bf = jax.block_until_ready(rnn_cell_forward(x, hy, pbf))
        assert jnp.allclose(out_bf, ref, atol=2e-2, rtol=2e-2)

        # Fused time loop: whole sequence in one pallas_call vs. step-by-step ref.
        h_seq = jax.block_until_ready(rnn_sequence_forward(xs, hy, p32))
        h_ref = hy
        for t in range(T):
            h_ref = rnn_cell_reference(xs[t], h_ref, wx_w, wx_b, wy_w, wy_b)
        assert h_seq.shape == (B, H)
        assert jnp.allclose(h_seq, h_ref, atol=1e-4, rtol=1e-4)

    print("KERNEL_OK")
</pallas_src>

<mosaic_0001>
module attributes {stable_mosaic.version = 11 : i64} {
  func.func @_rnn_cell_kernel(%arg0: i32, %arg1: memref<8x32xf32, #tpu.memory_space<vmem>>, %arg2: memref<8x32xf32, #tpu.memory_space<vmem>>, %arg3: memref<32x32xf32, #tpu.memory_space<vmem>>, %arg4: memref<32x32xf32, #tpu.memory_space<vmem>>, %arg5: memref<1x32xf32, #tpu.memory_space<vmem>>, %arg6: memref<8x32xf32, #tpu.memory_space<vmem>>) attributes {dimension_semantics = [#tpu.dimension_semantics<parallel>], iteration_bounds = array<i64: 1>, scalar_prefetch = 0 : i64, scratch_operands = 0 : i64, tpu.core_type = #tpu.core_type<tc>, window_params = [{transform_indices = @transform_0, window_bounds = array<i64: 8, 32>}, {transform_indices = @transform_1, window_bounds = array<i64: 8, 32>}, {pipeline_mode = #tpu.pipeline_mode<synchronous>, transform_indices = @transform_2, window_bounds = array<i64: 32, 32>}, {pipeline_mode = #tpu.pipeline_mode<synchronous>, transform_indices = @transform_3, window_bounds = array<i64: 32, 32>}, {pipeline_mode = #tpu.pipeline_mode<synchronous>, transform_indices = @transform_4, window_bounds = array<i64: 1, 32>}, {transform_indices = @transform_5, window_bounds = array<i64: 8, 32>}]} {
    %c0 = arith.constant 0 : index
    %c0_0 = arith.constant 0 : index
    %0 = vector.load %arg1[%c0, %c0_0] : memref<8x32xf32, #tpu.memory_space<vmem>>, vector<8x32xf32>
    %c0_1 = arith.constant 0 : index
    %c0_2 = arith.constant 0 : index
    %1 = vector.load %arg3[%c0_1, %c0_2] : memref<32x32xf32, #tpu.memory_space<vmem>>, vector<32x32xf32>
    %cst = arith.constant dense<0.000000e+00> : vector<8x32xf32>
    %2 = tpu.matmul %0, %1, %cst {dimension_numbers = #tpu.dot_dimension_numbers<[1], [0], [0], [1], [0, 0, 1, 1], [], []>} : vector<8x32xf32>, vector<32x32xf32>, vector<8x32xf32> -> vector<8x32xf32>
    %c0_3 = arith.constant 0 : index
    %c0_4 = arith.constant 0 : index
    %3 = vector.load %arg2[%c0_3, %c0_4] : memref<8x32xf32, #tpu.memory_space<vmem>>, vector<8x32xf32>
    %c0_5 = arith.constant 0 : index
    %c0_6 = arith.constant 0 : index
    %4 = vector.load %arg4[%c0_5, %c0_6] : memref<32x32xf32, #tpu.memory_space<vmem>>, vector<32x32xf32>
    %cst_7 = arith.constant dense<0.000000e+00> : vector<8x32xf32>
    %5 = tpu.matmul %3, %4, %cst_7 {dimension_numbers = #tpu.dot_dimension_numbers<[1], [0], [0], [1], [0, 0, 1, 1], [], []>} : vector<8x32xf32>, vector<32x32xf32>, vector<8x32xf32> -> vector<8x32xf32>
    %6 = arith.addf %2, %5 : vector<8x32xf32>
    %c0_8 = arith.constant 0 : index
    %c0_9 = arith.constant 0 : index
    %7 = vector.load %arg5[%c0_8, %c0_9] : memref<1x32xf32, #tpu.memory_space<vmem>>, vector<1x32xf32>
    %8 = vector.broadcast %7 : vector<1x32xf32> to vector<8x32xf32>
    %9 = arith.addf %6, %8 : vector<8x32xf32>
    %10 = math.tanh %9 : vector<8x32xf32>
    %c0_10 = arith.constant 0 : index
    %c0_11 = arith.constant 0 : index
    %11 = vector.load %arg6[%c0_10, %c0_11] : memref<8x32xf32, #tpu.memory_space<vmem>>, vector<8x32xf32>
    tpu.vector_store %arg6[%c0_10, %c0_11], %10 {strides = array<i32>} : memref<8x32xf32, #tpu.memory_space<vmem>>, vector<8x32xf32>,
    return
  }
  func.func @transform_0(%arg0: i32) -> (i32, i32) {
    %c0_i32 = arith.constant 0 : i32
    %c0_i32_0 = arith.constant 0 : i32
    return %arg0, %c0_i32 : i32, i32
  }
  func.func @transform_1(%arg0: i32) -> (i32, i32) {
    %c0_i32 = arith.constant 0 : i32
    %c0_i32_0 = arith.constant 0 : i32
    return %arg0, %c0_i32 : i32, i32
  }
  func.func @transform_2(%arg0: i32) -> (i32, i32) {
    %c0_i32 = arith.constant 0 : i32
    %c0_i32_0 = arith.constant 0 : i32
    %c0_i32_1 = arith.constant 0 : i32
    return %c0_i32, %c0_i32_0 : i32, i32
  }
  func.func @transform_3(%arg0: i32) -> (i32, i32) {
    %c0_i32 = arith.constant 0 : i32
    %c0_i32_0 = arith.constant 0 : i32
    %c0_i32_1 = arith.constant 0 : i32
    return %c0_i32, %c0_i32_0 : i32, i32
  }
  func.func @transform_4(%arg0: i32) -> (i32, i32) {
    %c0_i32 = arith.constant 0 : i32
    %c0_i32_0 = arith.constant 0 : i32
    %c0_i32_1 = arith.constant 0 : i32
    return %c0_i32, %c0_i32_0 : i32, i32
  }
  func.func @transform_5(%arg0: i32) -> (i32, i32) {
    %c0_i32 = arith.constant 0 : i32
    %c0_i32_0 = arith.constant 0 : i32
    return %arg0, %c0_i32 : i32, i32
  }
}

</mosaic_0001>

<bundles_post_ra>
// kernel: tpu_custom_call.1
= control target key start
LH: loop header
LB: loop body
LE: loop exit
PB: predicated region body
PF: predicated region fallthrough
CT: control target
= control target key end

     0   :  { %10 = vsyncpa [#allocation3], 0  ;;  %s361_s0 = inlined_call_operand.hbm [shape: f32[8,32], index: 0, kind: input, shape index: {}]   ;;  %s362_s1 = inlined_call_operand.hbm [shape: f32[8,32], index: 1, kind: input, shape index: {}]   ;;  %s363_s2 = inlined_call_operand.hbm [shape: f32[32,32], index: 2, kind: input, shape index: {}]   ;;  %s364_s3 = inlined_call_operand.hbm [shape: f32[32,32], index: 3, kind: input, shape index: {}]   ;;  %s365_s4 = inlined_call_operand.vmem [shape: f32[1,32], index: 4, kind: input, shape index: {}]   ;;  %s366_s5 = inlined_call_operand.hbm [shape: f32[8,32], index: 5, kind: output, shape index: {}]  }
   0x1   :  { %11 = vsyncpa [#allocation6], 0 }
   0x2   :  { %12 = vsyncpa [#allocation9], 0  ;;  %s30_s20 = sshll.u32 %s362_s1, 4  ;;  %s31_s20 = int_to_ptr.hbm [resolvable:$true] %s30_s20 }
   0x3   :  { %13 = vsyncpa [#allocation4], 0  ;;  %s303_s21 = smov [#allocation5]   ;;  %s19_s25 = sshll.u32 %s361_s0, 4  ;;  %s20_s25 = int_to_ptr.hbm [resolvable:$true] %s19_s25 }
   0x4   :  { %s32_s22 = sshll.u32 %s303_s21, 4  ;;  %s304_s26 = smov [#allocation2]   ;;  %s33_s22 = int_to_ptr.vmem [resolvable:$true] %s32_s22 }
   0x5   :  { %35 = dma.hbm_to_vmem [thread:$0]  %s31_s20, 128, %s33_s22, [#allocation6]  }
   0x6   :  { %s21_s27 = sshll.u32 %s304_s26, 4  ;;  %s40_s30 = sshll.u32 %s363_s2, 4  ;;  %s22_s27 = int_to_ptr.vmem [resolvable:$true] %s21_s27  ;;  %s41_s30 = int_to_ptr.hbm [resolvable:$true] %s40_s30 }
   0x7   :  { %24 = dma.hbm_to_vmem [thread:$0]  %s20_s25, 128, %s22_s27, [#allocation3]  }
   0x8   :  { %s305_s1 = smov [#allocation7]   ;;  %s53_s9 = sshll.u32 %s364_s3, 4  ;;  %s54_s9 = int_to_ptr.hbm [resolvable:$true] %s53_s9 }
   0x9   :  { %s42_s6 = sshll.u32 %s305_s1, 4  ;;  %s306_s10 = smov 128   ;;  %s43_s6 = int_to_ptr.vmem [resolvable:$true] %s42_s6 }
   0xa   :  { %s307_s0 = smov 8   ;;  %s308_s11 = smov [#allocation8]  }
   0xb   :  { %48 = dma.hbm_to_vmem [thread:$0]  %s41_s30, 512, %s43_s6, [#allocation6], %s306_s10, %s306_s10, %s307_s0  }
   0xc   :  { %s55_s12 = sshll.u32 %s308_s11, 4  ;;  %s56_s12 = int_to_ptr.vmem [resolvable:$true] %s55_s12 }
   0xd   :  { %61 = dma.hbm_to_vmem [thread:$0]  %s54_s9, 512, %s56_s12, [#allocation9], %s306_s10, %s306_s10, %s307_s0  }
   0xe   :  { %295 = dma.done.wait [#allocation3], 128  }
   0xf   :  { %296 = vsyncadd [#allocation3], 4294967168 }
  0x10   :  { %297 = dma.done.wait [#allocation6], 640  }
  0x11   :  { %298 = vsyncadd [#allocation6], 4294966656 }
  0x12   :  { %299 = dma.done.wait [#allocation9], 512  }
  0x13   :  { %300 = vsyncadd [#allocation9], 4294966784  ;;  %v89_v0 = vld [vmem:[#allocation8 + $0x18] sm:$0xff]  ;;  %v88_v2 = vld [vmem:[#allocation8 + $0x10] sm:$0xff]  ;;  %vm90_vm0 = vcmask 261120   ;;  %s309_s13 = smov [#allocation10]  }
  0x14   :  { %v84_v1 = vld [vmem:[#allocation7 + $0x18] sm:$0xff]  ;;  %106 = vmatpush.msra.mxu0 %v89_v0  ;;  %v83_v3 = vld [vmem:[#allocation7 + $0x10] sm:$0xff]  ;;  %v87_v4 = vld [vmem:[#allocation8 + $0x8] sm:$0xff]  ;;  %s149_s14 = sshll.u32 %s309_s13, 4  ;;  %s151_s17 = sshll.u32 %s366_s5, 4  ;;  %s150_s14 = int_to_ptr.vmem [resolvable:$true] %s149_s14  ;;  %s152_s17 = int_to_ptr.hbm [resolvable:$true] %s151_s17 }
  0x15   :  { %129 = vmatpush.msra.mxu1 %v84_v1  ;;  %v82_v5 = vld [vmem:[#allocation7 + $0x8] sm:$0xff]  ;;  %v86_v6 = vld [vmem:[#allocation8] sm:$0xff]  ;;  %v85_v8 = vld [vmem:[#allocation5] sm:$0xff] }
  0x16   :  { %107 = vmatpush.msra.mxu0 %v88_v2  ;;  %v81_v7 = vld [vmem:[#allocation7] sm:$0xff]  ;;  %v80_v9 = vld [vmem:[#allocation2] sm:$0xff] }
  0x17   :  { %130 = vmatpush.msra.mxu1 %v83_v3  ;;  %v172_v10 = vld [vmem:[%s365_s4] ss:$0 sm:$0xff] }
  0x18   :  { %108 = vmatpush.msra.mxu0 %v87_v4 }
  0x19   :  { %131 = vmatpush.msra.mxu1 %v82_v5 }
  0x1a   :  { %109 = vmatpush.msra.mxu0 %v86_v6 }
  0x1b   :  { %132 = vmatpush.msra.mxu1 %v81_v7  ;;  %163 = vmatmul.msk.f32.vlgmr.msra.gmra.mxu0 %vm90_vm0, %v85_v8 }
  0x1c   :  { %164 = vmatmul.msk.f32.vlgmr.msra.gmra.mxu1 %vm90_vm0, %v80_v9 }
  0x98   :  { %v111_v11 = vpop.f32.mrf.mxu0 }
  0x99   :  { %v134_v12 = vpop.f32.mrf.mxu1 }
  0x9a   :  { %v135_v13 = vadd.f32 %v134_v12, %v111_v11 }
  0x9c   :  { %v141_v14 = vadd.f32 %v172_v10, %v135_v13 }
  0x9e   :  { %173 = vtanh.f32 %v141_v14 }
  0xa4   :  { %v174_v15 = vpop.eup %173 }
  0xa5   :  { %143 = vst.msk [vmem:[#allocation10] sm:$0xff] %vm90_vm0, %v174_v15 }
  0xa6   :  { %154 = dma.vmem_to_hbm [thread:$0]  %s150_s14, 128, %s152_s17, [#allocation4]  }
  0xa7   :  { %301 = dma.done.wait [#allocation4], 128  }
  0xa8   :  { %302 = vsyncadd [#allocation4], 4294967168 }
  0xa9   :  { %159 = vsyncpa [#allocation3], 1 }
  0xaa   :  { %160 = vsyncpa [#allocation6], 1 }
  0xab   :  { %161 = vsyncpa [#allocation9], 1 }
  0xac   :  { %162 = vsyncpa [#allocation4], 1 }

</bundles_post_ra>
